<compile_context>
chip_gen: v5e
topology: v5e:2x2
jax: 0.10.0
libtpu: 0.0.40
codegen_flags: <defaults>
</compile_context>

<pallas_src>
import jax
import jax.numpy as jnp
from jax.experimental import pallas as pl
from jax.experimental.pallas import tpu as pltpu


def _lc1d_kernel(x_ref, w_ref, b_ref, o_ref):
    # x_ref : (block_B, in_len)   batch tile of the raw input
    # w_ref : (in_len, C*L)       block-diagonal weight slab (resident)
    # b_ref : (1, C*L)            flattened bias in torch output order (resident)
    # o_ref : (block_B, C*L)      output tile, already in torch's final layout
    acc = jnp.dot(x_ref[...], w_ref[...], preferred_element_type=jnp.float32)
    o_ref[...] = (acc + b_ref[...]).astype(o_ref.dtype)


def locally_connected_1d(x, weights, biases, *, stride, receptive_field_shape):
    """
    x       : (B, in_len)  float32
    weights : (output_length, rf, out_channels)   (= torch Linear weight .T per field)
    biases  : (output_length, out_channels)
    returns : (B, out_channels * output_length)
    """
    B, in_len = x.shape
    L, rf, C = weights.shape
    assert rf == receptive_field_shape
    assert (in_len - rf) % stride == 0
    assert L == (in_len - rf) // stride + 1

    # Build the block-diagonal weight slab once, outside the kernel, with
    # static pads (constant-foldable when weights are constants).
    #   W_bd[i, c*L + f] = weights[f, i - f*stride, c]  if i in field f, else 0
    per_field = []
    for f in range(L):
        pad_top = f * stride
        pad_bot = in_len - (pad_top + rf)
        per_field.append(jnp.pad(weights[f], ((pad_top, pad_bot), (0, 0))))
    w_bd = jnp.stack(per_field, axis=0)            # (L, in_len, C)
    w_bd = jnp.transpose(w_bd, (1, 2, 0))          # (in_len, C, L)
    w_bd = w_bd.reshape(in_len, C * L)             # (in_len, C*L)

    # bias_flat[0, c*L + f] = biases[f, c]  -> matches torch permute(1,2,0).reshape
    bias_flat = biases.T.reshape(1, C * L)

    # Batch tiling: single grid step for small B; 512-row tiles for large B so
    # the MXU sees a big M while x tiles stay small in VMEM.  Non-divisible
    # batch sizes are handled by Pallas block masking.
    block_b = B if B <= 512 else 512
    grid = (pl.cdiv(B, block_b),)

    out = pl.pallas_call(
        _lc1d_kernel,
        out_shape=jax.ShapeDtypeStruct((B, C * L), x.dtype),
        grid_spec=pltpu.PrefetchScalarGridSpec(
            num_scalar_prefetch=0,
            grid=grid,
            in_specs=[
                # batch tile of the raw input
                pl.BlockSpec((block_b, in_len), lambda i: (i, 0)),
                # full weight / bias slabs, constant block index (stay resident)
                pl.BlockSpec((in_len, C * L), lambda i: (0, 0)),
                pl.BlockSpec((1, C * L), lambda i: (0, 0)),
            ],
            out_specs=pl.BlockSpec((block_b, C * L), lambda i: (i, 0)),
        ),
        compiler_params=pltpu.CompilerParams(
            # batch axis is independent -> shard across TCs on v7x
            dimension_semantics=("parallel",),
        ),
    )(x, w_bd, bias_flat)

    # Output is already (B, C*L) in torch's permute(1,2,0).reshape order.
    return out


def _reference(x, weights, biases, *, stride, receptive_field_shape):
    """Pure-JAX reference mirroring the PyTorch loop."""
    output_length = weights.shape[0]
    outs = []
    for f in range(output_length):
        xs = x[:, f * stride: f * stride + receptive_field_shape]
        outs.append(xs @ weights[f] + biases[f])
    stacked = jnp.stack(outs)                       # (L, B, C)
    result = jnp.transpose(stacked, (1, 2, 0))      # (B, C, L)
    return result.reshape(x.shape[0], -1)


if __name__ == "__main__":
    # Small, consistent configuration:
    #   in_shape=64, out_channels=8, receptive_field_shape=16, stride=16
    #   -> output_length = (64 - 16)/16 + 1 = 4
    batch = 4
    in_shape = 64
    out_channels = 8
    receptive_field_shape = 16
    stride = 16
    output_length = (in_shape - receptive_field_shape) // stride + 1

    key = jax.random.PRNGKey(0)
    kx, kw, kb = jax.random.split(key, 3)

    x = jax.random.normal(kx, (batch, in_shape), dtype=jnp.float32)
    # Deterministic synthetic parameters (shapes from the module's __init__:
    # output_length x Linear(receptive_field_shape, out_channels)).
    weights = jax.random.normal(
        kw, (output_length, receptive_field_shape, out_channels), dtype=jnp.float32
    ) * 0.1
    biases = jax.random.normal(
        kb, (output_length, out_channels), dtype=jnp.float32
    ) * 0.1

    out = locally_connected_1d(
        x, weights, biases,
        stride=stride, receptive_field_shape=receptive_field_shape,
    )
    out = jax.block_until_ready(out)

    ref = _reference(
        x, weights, biases,
        stride=stride, receptive_field_shape=receptive_field_shape,
    )
    assert out.shape == (batch, out_channels * output_length), out.shape
    assert jnp.allclose(out, ref, atol=1e-5, rtol=1e-5), "mismatch vs reference"

    print("KERNEL_OK")
</pallas_src>

<mosaic_0001>
module attributes {stable_mosaic.version = 11 : i64} {
  func.func @_lc1d_kernel(%arg0: i32, %arg1: memref<4x64xf32, #tpu.memory_space<vmem>>, %arg2: memref<64x32xf32, #tpu.memory_space<vmem>>, %arg3: memref<1x32xf32, #tpu.memory_space<vmem>>, %arg4: memref<4x32xf32, #tpu.memory_space<vmem>>) attributes {dimension_semantics = [#tpu.dimension_semantics<parallel>], iteration_bounds = array<i64: 1>, scalar_prefetch = 0 : i64, scratch_operands = 0 : i64, tpu.core_type = #tpu.core_type<tc>, window_params = [{transform_indices = @transform_0, window_bounds = array<i64: 4, 64>}, {pipeline_mode = #tpu.pipeline_mode<synchronous>, transform_indices = @transform_1, window_bounds = array<i64: 64, 32>}, {pipeline_mode = #tpu.pipeline_mode<synchronous>, transform_indices = @transform_2, window_bounds = array<i64: 1, 32>}, {transform_indices = @transform_3, window_bounds = array<i64: 4, 32>}]} {
    %c0 = arith.constant 0 : index
    %c0_0 = arith.constant 0 : index
    %0 = vector.load %arg1[%c0, %c0_0] : memref<4x64xf32, #tpu.memory_space<vmem>>, vector<4x64xf32>
    %c0_1 = arith.constant 0 : index
    %c0_2 = arith.constant 0 : index
    %1 = vector.load %arg2[%c0_1, %c0_2] : memref<64x32xf32, #tpu.memory_space<vmem>>, vector<64x32xf32>
    %cst = arith.constant dense<0.000000e+00> : vector<4x32xf32>
    %2 = tpu.matmul %0, %1, %cst {dimension_numbers = #tpu.dot_dimension_numbers<[1], [0], [0], [1], [0, 0, 1, 1], [], []>} : vector<4x64xf32>, vector<64x32xf32>, vector<4x32xf32> -> vector<4x32xf32>
    %c0_3 = arith.constant 0 : index
    %c0_4 = arith.constant 0 : index
    %3 = vector.load %arg3[%c0_3, %c0_4] : memref<1x32xf32, #tpu.memory_space<vmem>>, vector<1x32xf32>
    %4 = vector.broadcast %3 : vector<1x32xf32> to vector<4x32xf32>
    %5 = arith.addf %2, %4 : vector<4x32xf32>
    %c0_5 = arith.constant 0 : index
    %c0_6 = arith.constant 0 : index
    %6 = vector.load %arg4[%c0_5, %c0_6] : memref<4x32xf32, #tpu.memory_space<vmem>>, vector<4x32xf32>
    tpu.vector_store %arg4[%c0_5, %c0_6], %5 {strides = array<i32>} : memref<4x32xf32, #tpu.memory_space<vmem>>, vector<4x32xf32>,
    return
  }
  func.func @transform_0(%arg0: i32) -> (i32, i32) {
    %c0_i32 = arith.constant 0 : i32
    %c0_i32_0 = arith.constant 0 : i32
    return %arg0, %c0_i32 : i32, i32
  }
  func.func @transform_1(%arg0: i32) -> (i32, i32) {
    %c0_i32 = arith.constant 0 : i32
    %c0_i32_0 = arith.constant 0 : i32
    %c0_i32_1 = arith.constant 0 : i32
    return %c0_i32, %c0_i32_0 : i32, i32
  }
  func.func @transform_2(%arg0: i32) -> (i32, i32) {
    %c0_i32 = arith.constant 0 : i32
    %c0_i32_0 = arith.constant 0 : i32
    %c0_i32_1 = arith.constant 0 : i32
    return %c0_i32, %c0_i32_0 : i32, i32
  }
  func.func @transform_3(%arg0: i32) -> (i32, i32) {
    %c0_i32 = arith.constant 0 : i32
    %c0_i32_0 = arith.constant 0 : i32
    return %arg0, %c0_i32 : i32, i32
  }
}

</mosaic_0001>

<bundles_post_ra>
// kernel: tpu_custom_call.1
= control target key start
LH: loop header
LB: loop body
LE: loop exit
PB: predicated region body
PF: predicated region fallthrough
CT: control target
= control target key end

     0   :  { %s153_s0 = inlined_call_operand.vmem [shape: f32[4,64], index: 0, kind: input, shape index: {}]   ;;  %s154_s1 = inlined_call_operand.vmem [shape: f32[64,32], index: 1, kind: input, shape index: {}]   ;;  %s155_s2 = inlined_call_operand.vmem [shape: f32[1,32], index: 2, kind: input, shape index: {}]   ;;  %s156_s3 = inlined_call_operand.hbm [shape: f32[4,32], index: 3, kind: output, shape index: {}]  }
   0x1   :  { %v23_v0 = vld [vmem:[%s154_s1 + $0x38] sm:$0xff]  ;;  %v22_v1 = vld [vmem:[%s154_s1 + $0x30] sm:$0xff]  ;;  %v21_v2 = vld [vmem:[%s154_s1 + $0x28] sm:$0xff] }
   0x2   :  { %40 = vmatpush.msra.mxu0 %v23_v0 }
   0x4   :  { %41 = vmatpush.msra.mxu0 %v22_v1 }
   0x5   :  { %8 = vsyncpa [#allocation3], 0  ;;  %v20_v3 = vld [vmem:[%s154_s1 + $0x20] sm:$0xff]  ;;  %v19_v4 = vld [vmem:[%s154_s1 + $0x18] sm:$0xff]  ;;  %vm28_vm0 = vcmask 523264   ;;  %s99_s5 = smov [#allocation2]  }
   0x6   :  { %42 = vmatpush.msra.mxu0 %v21_v2  ;;  %v18_v5 = vld [vmem:[%s154_s1 + $0x10] sm:$0xff]  ;;  %v17_v6 = vld [vmem:[%s154_s1 + $0x8] sm:$0xff]  ;;  %v16_v7 = vld [vmem:[%s154_s1] sm:$0xff]  ;;  %s59_s6 = sshll.u32 %s99_s5, 4  ;;  %s61_s9 = sshll.u32 %s156_s3, 4  ;;  %vm52_vm1 = vcmask 257024   ;;  %s60_s6 = int_to_ptr.vmem [resolvable:$true] %s59_s6  ;;  %s62_s9 = int_to_ptr.hbm [resolvable:$true] %s61_s9 }
   0x7   :  { %v15_v8 = vld [vmem:[%s153_s0] sm:$0xf] }
   0x8   :  { %43 = vmatpush.msra.mxu0 %v20_v3  ;;  %v72_v9 = vld [vmem:[%s155_s2] ss:$0 sm:$0xff] }
   0xa   :  { %44 = vmatpush.msra.mxu0 %v19_v4 }
   0xc   :  { %45 = vmatpush.msra.mxu0 %v18_v5 }
   0xe   :  { %46 = vmatpush.msra.mxu0 %v17_v6 }
  0x10   :  { %47 = vmatpush.msra.mxu0 %v16_v7 }
  0x11   :  { %70 = vmatmul.msk.f32.vlgmr.msra.gmra.mxu0 %vm28_vm0, %v15_v8 }
  0x8e   :  { %v49_v10 = vpop.f32.mrf.mxu0 }
  0x8f   :  { %v50_v11 = vadd.f32 %v72_v9, %v49_v10 }
  0x91   :  { %53 = vst.msk [vmem:[#allocation2] sm:$0xf] %vm52_vm1, %v50_v11 }
  0x92   :  { %64 = dma.vmem_to_hbm [thread:$0]  %s60_s6, 64, %s62_s9, [#allocation3]  }
  0x93   :  { %97 = dma.done.wait [#allocation3], 64  }
  0x94   :  { %98 = vsyncadd [#allocation3], 4294967232 }
  0x95   :  { %69 = vsyncpa [#allocation3], 1 }

</bundles_post_ra>
